<compile_context>
chip_gen: v7x
topology: tpu7x:2x2x1
jax: 0.10.0
libtpu: 0.0.40
codegen_flags: <defaults>
</compile_context>

<pallas_src>
import functools

import jax
import jax.numpy as jnp
from jax.experimental import pallas as pl
from jax.experimental.pallas import tpu as pltpu

_LANE = 128
_SUBLANE = 8


def _round_up(n, m):
    return ((n + m - 1) // m) * m


def _cdiv(a, b):
    return -(-a // b)


def _mlp_kernel(x_ref, w1_ref, b1_ref, w2_ref, b2_ref, w3_ref, b3_ref,
                w4_ref, b4_ref, o_ref):
    # Matmuls: bf16 x bf16 on the MXU with f32 accumulation.
    # Epilogue: f32 bias-add + ReLU (v5e-safe), then repack to bf16 so the
    # next layer's LHS is half-width (no separate cast op, less VMEM/vreg).
    h = jnp.dot(x_ref[...], w1_ref[...], preferred_element_type=jnp.float32)
    h = jnp.maximum(h + b1_ref[...], 0.0).astype(jnp.bfloat16)

    h = jnp.dot(h, w2_ref[...], preferred_element_type=jnp.float32)
    h = jnp.maximum(h + b2_ref[...], 0.0).astype(jnp.bfloat16)

    h = jnp.dot(h, w3_ref[...], preferred_element_type=jnp.float32)
    h = jnp.maximum(h + b3_ref[...], 0.0).astype(jnp.bfloat16)

    # Final layer: MXU matmul over a full 128-lane (zero-padded) w4, but only
    # the first o_ref.shape[-1] (= out_dim rounded to 8) f32 columns get
    # stored -> tiny HBM writeback instead of a 64x-padded one.
    out = jnp.dot(h, w4_ref[...], preferred_element_type=jnp.float32)
    nc = o_ref.shape[-1]
    o_ref[...] = (out[:, :nc] + b4_ref[...]).astype(o_ref.dtype)


@functools.partial(jax.jit, static_argnames=("out_dim",))
def mlp_forward(x, params, *, out_dim=2):
    """x: (B, input_dim) f32; params: dict with bf16 weights w{i} of shape
    (in_dim, out_dim_i) and f32 biases b{i} of shape (1, out_dim_i).
    Returns (B, out_dim) f32."""
    B, in_dim = x.shape
    hidden = params["w2"].shape[0]

    # ---- batch tiling ------------------------------------------------------
    # Big tiles (up to ~1024 rows) amortize the ~0.35 us per-grid-step cost;
    # force >= 2 tiles whenever B >= 16 so both v7x TensorCores get work.
    n_tiles = max(1, _cdiv(B, 1024))
    if n_tiles == 1 and B >= 16:
        n_tiles = 2
    TB = _round_up(_cdiv(B, n_tiles), _SUBLANE)
    B_pad = n_tiles * TB

    x = x.astype(jnp.bfloat16)               # halves x DMA, drops in-kernel cast
    if B_pad != B:
        x = jnp.pad(x, ((0, B_pad - B), (0, 0)))

    # ---- last-layer padding ------------------------------------------------
    # w4 padded to 128 lanes (MXU-friendly matmul); store only out_store cols.
    out_mm = _round_up(out_dim, _LANE)
    out_store = _round_up(out_dim, _SUBLANE)
    w4 = params["w4"]
    b4 = params["b4"]
    if w4.shape[1] != out_mm:
        w4 = jnp.pad(w4, ((0, 0), (0, out_mm - w4.shape[1])))
    if b4.shape[1] != out_store:
        b4 = jnp.pad(b4, ((0, 0), (0, out_store - b4.shape[1])))
    else:
        b4 = b4[:, :out_store]

    grid = (B_pad // TB,)

    def batched(i):        # x / out move with the batch tile
        return (i, 0)

    def resident(i):       # weights & biases pinned in VMEM across grid steps
        return (0, 0)

    in_specs = [
        pl.BlockSpec((TB, in_dim), batched),          # x (bf16)
        pl.BlockSpec((in_dim, hidden), resident),     # w1
        pl.BlockSpec((1, hidden), resident),          # b1
        pl.BlockSpec((hidden, hidden), resident),     # w2
        pl.BlockSpec((1, hidden), resident),          # b2
        pl.BlockSpec((hidden, hidden), resident),     # w3
        pl.BlockSpec((1, hidden), resident),          # b3
        pl.BlockSpec((hidden, out_mm), resident),     # w4 (128-lane padded)
        pl.BlockSpec((1, out_store), resident),       # b4 (8-col padded)
    ]
    out_specs = pl.BlockSpec((TB, out_store), batched)

    # Advisory cost hint: mostly MXU work after the one-time weight fetch.
    flops = 2 * B_pad * (in_dim * hidden + 2 * hidden * hidden
                         + hidden * out_mm)
    weight_bytes = (params["w1"].size + params["w2"].size
                    + params["w3"].size + w4.size) * 2          # bf16
    bias_bytes = (params["b1"].size + params["b2"].size
                  + params["b3"].size + b4.size) * 4            # f32
    io_bytes = x.size * 2 + B_pad * out_store * 4
    cost = pl.CostEstimate(flops=flops, transcendentals=0,
                           bytes_accessed=weight_bytes + bias_bytes + io_bytes)

    out_padded = pl.pallas_call(
        _mlp_kernel,
        out_shape=jax.ShapeDtypeStruct((B_pad, out_store), jnp.float32),
        grid=grid,
        in_specs=in_specs,
        out_specs=out_specs,
        compiler_params=pltpu.CompilerParams(
            dimension_semantics=("parallel",),        # batch tiles -> both TCs
            vmem_limit_bytes=48 * 1024 * 1024),       # safe on v5e/v6e/v7x
        cost_estimate=cost,
    )(x,
      params["w1"], params["b1"],
      params["w2"], params["b2"],
      params["w3"], params["b3"],
      w4, b4)

    return out_padded[:B, :out_dim]


def init_params(key, input_state_dim=4, output_state_dim=2, hidden=512):
    """torch nn.Linear-style init (uniform +-1/sqrt(fan_in)). Weights stored
    transposed vs torch, i.e. (in_dim, out_dim), cast to bf16 for the MXU;
    biases kept f32."""
    dims = [(input_state_dim, hidden), (hidden, hidden),
            (hidden, hidden), (hidden, output_state_dim)]
    params = {}
    for i, (fan_in, fan_out) in enumerate(dims, start=1):
        key, kw, kb = jax.random.split(key, 3)
        bound = 1.0 / (fan_in ** 0.5)
        w = jax.random.uniform(kw, (fan_in, fan_out), jnp.float32,
                               minval=-bound, maxval=bound)
        b = jax.random.uniform(kb, (1, fan_out), jnp.float32,
                               minval=-bound, maxval=bound)
        params[f"w{i}"] = w.astype(jnp.bfloat16)
        params[f"b{i}"] = b
    return params


def _reference(x, params):
    """Pure-JAX reference mimicking the kernel's bf16-weight / bf16-activation
    matmuls with f32 accumulation."""
    h = x
    for i in range(1, 4):
        w = params[f"w{i}"].astype(jnp.float32)
        h = h.astype(jnp.bfloat16).astype(jnp.float32) @ w + params[f"b{i}"]
        h = jnp.maximum(h, 0.0)
    w4 = params["w4"].astype(jnp.float32)
    return h.astype(jnp.bfloat16).astype(jnp.float32) @ w4 + params["b4"]


if __name__ == "__main__":
    key = jax.random.PRNGKey(0)
    key, kx = jax.random.split(key)

    B, input_state_dim, output_state_dim = 8, 4, 2
    x = jax.random.normal(kx, (B, input_state_dim), dtype=jnp.float32)

    params = init_params(key, input_state_dim, output_state_dim)

    out = mlp_forward(x, params, out_dim=output_state_dim)
    out = jax.block_until_ready(out)

    ref = _reference(x, params)
    assert out.shape == (B, output_state_dim)
    assert jnp.allclose(out, ref, atol=1e-2, rtol=1e-2), (
        f"max abs err {jnp.max(jnp.abs(out - ref))}")

    print("KERNEL_OK")
</pallas_src>

<mosaic_0001>
module attributes {stable_mosaic.version = 11 : i64} {
  func.func @_mlp_kernel(%arg0: i32, %arg1: memref<8x4xbf16, #tpu.memory_space<vmem>>, %arg2: memref<4x512xbf16, #tpu.memory_space<vmem>>, %arg3: memref<1x512xf32, #tpu.memory_space<vmem>>, %arg4: memref<512x512xbf16, #tpu.memory_space<vmem>>, %arg5: memref<1x512xf32, #tpu.memory_space<vmem>>, %arg6: memref<512x512xbf16, #tpu.memory_space<vmem>>, %arg7: memref<1x512xf32, #tpu.memory_space<vmem>>, %arg8: memref<512x128xbf16, #tpu.memory_space<vmem>>, %arg9: memref<1x8xf32, #tpu.memory_space<vmem>>, %arg10: memref<8x8xf32, #tpu.memory_space<vmem>>) attributes {dimension_semantics = [#tpu.dimension_semantics<parallel>], iteration_bounds = array<i64: 1>, scalar_prefetch = 0 : i64, scratch_operands = 0 : i64, tpu.core_type = #tpu.core_type<tc>, window_params = [{transform_indices = @transform_0, window_bounds = array<i64: 8, 4>}, {pipeline_mode = #tpu.pipeline_mode<synchronous>, transform_indices = @transform_1, window_bounds = array<i64: 4, 512>}, {pipeline_mode = #tpu.pipeline_mode<synchronous>, transform_indices = @transform_2, window_bounds = array<i64: 1, 512>}, {pipeline_mode = #tpu.pipeline_mode<synchronous>, transform_indices = @transform_3, window_bounds = array<i64: 512, 512>}, {pipeline_mode = #tpu.pipeline_mode<synchronous>, transform_indices = @transform_4, window_bounds = array<i64: 1, 512>}, {pipeline_mode = #tpu.pipeline_mode<synchronous>, transform_indices = @transform_5, window_bounds = array<i64: 512, 512>}, {pipeline_mode = #tpu.pipeline_mode<synchronous>, transform_indices = @transform_6, window_bounds = array<i64: 1, 512>}, {pipeline_mode = #tpu.pipeline_mode<synchronous>, transform_indices = @transform_7, window_bounds = array<i64: 512, 128>}, {pipeline_mode = #tpu.pipeline_mode<synchronous>, transform_indices = @transform_8, window_bounds = array<i64: 1, 8>}, {transform_indices = @transform_9, window_bounds = array<i64: 8, 8>}]} {
    %c0 = arith.constant 0 : index
    %c0_0 = arith.constant 0 : index
    %0 = vector.load %arg1[%c0, %c0_0] : memref<8x4xbf16, #tpu.memory_space<vmem>>, vector<8x4xbf16>
    %c0_1 = arith.constant 0 : index
    %c0_2 = arith.constant 0 : index
    %1 = vector.load %arg2[%c0_1, %c0_2] : memref<4x512xbf16, #tpu.memory_space<vmem>>, vector<4x512xbf16>
    %cst = arith.constant dense<0.000000e+00> : vector<8x512xf32>
    %2 = tpu.matmul %0, %1, %cst {dimension_numbers = #tpu.dot_dimension_numbers<[1], [0], [0], [1], [0, 0, 1, 1], [], []>} : vector<8x4xbf16>, vector<4x512xbf16>, vector<8x512xf32> -> vector<8x512xf32>
    %c0_3 = arith.constant 0 : index
    %c0_4 = arith.constant 0 : index
    %3 = vector.load %arg3[%c0_3, %c0_4] : memref<1x512xf32, #tpu.memory_space<vmem>>, vector<1x512xf32>
    %4 = vector.broadcast %3 : vector<1x512xf32> to vector<8x512xf32>
    %5 = arith.addf %2, %4 : vector<8x512xf32>
    %cst_5 = arith.constant 0.000000e+00 : f32
    %6 = vector.broadcast %cst_5 : f32 to vector<8x512xf32>
    %7 = arith.maximumf %5, %6 : vector<8x512xf32>
    %8 = arith.truncf %7 : vector<8x512xf32> to vector<8x512xbf16>
    %c0_6 = arith.constant 0 : index
    %c0_7 = arith.constant 0 : index
    %9 = vector.load %arg4[%c0_6, %c0_7] : memref<512x512xbf16, #tpu.memory_space<vmem>>, vector<512x512xbf16>
    %cst_8 = arith.constant dense<0.000000e+00> : vector<8x512xf32>
    %10 = tpu.matmul %8, %9, %cst_8 {dimension_numbers = #tpu.dot_dimension_numbers<[1], [0], [0], [1], [0, 0, 1, 1], [], []>} : vector<8x512xbf16>, vector<512x512xbf16>, vector<8x512xf32> -> vector<8x512xf32>
    %c0_9 = arith.constant 0 : index
    %c0_10 = arith.constant 0 : index
    %11 = vector.load %arg5[%c0_9, %c0_10] : memref<1x512xf32, #tpu.memory_space<vmem>>, vector<1x512xf32>
    %12 = vector.broadcast %11 : vector<1x512xf32> to vector<8x512xf32>
    %13 = arith.addf %10, %12 : vector<8x512xf32>
    %cst_11 = arith.constant 0.000000e+00 : f32
    %14 = vector.broadcast %cst_11 : f32 to vector<8x512xf32>
    %15 = arith.maximumf %13, %14 : vector<8x512xf32>
    %16 = arith.truncf %15 : vector<8x512xf32> to vector<8x512xbf16>
    %c0_12 = arith.constant 0 : index
    %c0_13 = arith.constant 0 : index
    %17 = vector.load %arg6[%c0_12, %c0_13] : memref<512x512xbf16, #tpu.memory_space<vmem>>, vector<512x512xbf16>
    %cst_14 = arith.constant dense<0.000000e+00> : vector<8x512xf32>
    %18 = tpu.matmul %16, %17, %cst_14 {dimension_numbers = #tpu.dot_dimension_numbers<[1], [0], [0], [1], [0, 0, 1, 1], [], []>} : vector<8x512xbf16>, vector<512x512xbf16>, vector<8x512xf32> -> vector<8x512xf32>
    %c0_15 = arith.constant 0 : index
    %c0_16 = arith.constant 0 : index
    %19 = vector.load %arg7[%c0_15, %c0_16] : memref<1x512xf32, #tpu.memory_space<vmem>>, vector<1x512xf32>
    %20 = vector.broadcast %19 : vector<1x512xf32> to vector<8x512xf32>
    %21 = arith.addf %18, %20 : vector<8x512xf32>
    %cst_17 = arith.constant 0.000000e+00 : f32
    %22 = vector.broadcast %cst_17 : f32 to vector<8x512xf32>
    %23 = arith.maximumf %21, %22 : vector<8x512xf32>
    %24 = arith.truncf %23 : vector<8x512xf32> to vector<8x512xbf16>
    %c0_18 = arith.constant 0 : index
    %c0_19 = arith.constant 0 : index
    %25 = vector.load %arg8[%c0_18, %c0_19] : memref<512x128xbf16, #tpu.memory_space<vmem>>, vector<512x128xbf16>
    %cst_20 = arith.constant dense<0.000000e+00> : vector<8x128xf32>
    %26 = tpu.matmul %24, %25, %cst_20 {dimension_numbers = #tpu.dot_dimension_numbers<[1], [0], [0], [1], [0, 0, 1, 1], [], []>} : vector<8x512xbf16>, vector<512x128xbf16>, vector<8x128xf32> -> vector<8x128xf32>
    %27 = vector.extract_strided_slice %26 {offsets = [0, 0], sizes = [8, 8], strides = [1, 1]} : vector<8x128xf32> to vector<8x8xf32>
    %c0_21 = arith.constant 0 : index
    %c0_22 = arith.constant 0 : index
    %28 = vector.load %arg9[%c0_21, %c0_22] : memref<1x8xf32, #tpu.memory_space<vmem>>, vector<1x8xf32>
    %29 = vector.broadcast %28 : vector<1x8xf32> to vector<8x8xf32>
    %30 = arith.addf %27, %29 : vector<8x8xf32>
    %c0_23 = arith.constant 0 : index
    %c0_24 = arith.constant 0 : index
    %31 = vector.load %arg10[%c0_23, %c0_24] : memref<8x8xf32, #tpu.memory_space<vmem>>, vector<8x8xf32>
    tpu.vector_store %arg10[%c0_23, %c0_24], %30 {strides = array<i32>} : memref<8x8xf32, #tpu.memory_space<vmem>>, vector<8x8xf32>,
    return
  }
  func.func @transform_0(%arg0: i32) -> (i32, i32) {
    %c0_i32 = arith.constant 0 : i32
    %c0_i32_0 = arith.constant 0 : i32
    return %arg0, %c0_i32 : i32, i32
  }
  func.func @transform_1(%arg0: i32) -> (i32, i32) {
    %c0_i32 = arith.constant 0 : i32
    %c0_i32_0 = arith.constant 0 : i32
    %c0_i32_1 = arith.constant 0 : i32
    return %c0_i32, %c0_i32_0 : i32, i32
  }
  func.func @transform_2(%arg0: i32) -> (i32, i32) {
    %c0_i32 = arith.constant 0 : i32
    %c0_i32_0 = arith.constant 0 : i32
    %c0_i32_1 = arith.constant 0 : i32
    return %c0_i32, %c0_i32_0 : i32, i32
  }
  func.func @transform_3(%arg0: i32) -> (i32, i32) {
    %c0_i32 = arith.constant 0 : i32
    %c0_i32_0 = arith.constant 0 : i32
    %c0_i32_1 = arith.constant 0 : i32
    return %c0_i32, %c0_i32_0 : i32, i32
  }
  func.func @transform_4(%arg0: i32) -> (i32, i32) {
    %c0_i32 = arith.constant 0 : i32
    %c0_i32_0 = arith.constant 0 : i32
    %c0_i32_1 = arith.constant 0 : i32
    return %c0_i32, %c0_i32_0 : i32, i32
  }
  func.func @transform_5(%arg0: i32) -> (i32, i32) {
    %c0_i32 = arith.constant 0 : i32
    %c0_i32_0 = arith.constant 0 : i32
    %c0_i32_1 = arith.constant 0 : i32
    return %c0_i32, %c0_i32_0 : i32, i32
  }
  func.func @transform_6(%arg0: i32) -> (i32, i32) {
    %c0_i32 = arith.constant 0 : i32
    %c0_i32_0 = arith.constant 0 : i32
    %c0_i32_1 = arith.constant 0 : i32
    return %c0_i32, %c0_i32_0 : i32, i32
  }
  func.func @transform_7(%arg0: i32) -> (i32, i32) {
    %c0_i32 = arith.constant 0 : i32
    %c0_i32_0 = arith.constant 0 : i32
    %c0_i32_1 = arith.constant 0 : i32
    return %c0_i32, %c0_i32_0 : i32, i32
  }
  func.func @transform_8(%arg0: i32) -> (i32, i32) {
    %c0_i32 = arith.constant 0 : i32
    %c0_i32_0 = arith.constant 0 : i32
    %c0_i32_1 = arith.constant 0 : i32
    return %c0_i32, %c0_i32_0 : i32, i32
  }
  func.func @transform_9(%arg0: i32) -> (i32, i32) {
    %c0_i32 = arith.constant 0 : i32
    %c0_i32_0 = arith.constant 0 : i32
    return %arg0, %c0_i32 : i32, i32
  }
}

</mosaic_0001>

<bundles_post_ra>
// kernel: mlp_forward.1
= control target key start
LH: loop header
LB: loop body
LE: loop exit
PB: predicated region body
PF: predicated region fallthrough
CT: control target
= control target key end

     0   :  { %14 = vsyncpa [#allocation3], 0  ;;  %s3560_s0 = inlined_call_operand.vmem [shape: bf16[8,4], index: 0, kind: input, shape index: {}]   ;;  %s3561_s1 = inlined_call_operand.vmem [shape: bf16[4,512], index: 1, kind: input, shape index: {}]   ;;  %s3562_s2 = inlined_call_operand.vmem [shape: f32[1,512], index: 2, kind: input, shape index: {}]   ;;  %s3563_s3 = inlined_call_operand.hbm [shape: bf16[512,512], index: 3, kind: input, shape index: {}]   ;;  %s3564_s4 = inlined_call_operand.vmem [shape: f32[1,512], index: 4, kind: input, shape index: {}]   ;;  %s3565_s5 = inlined_call_operand.hbm [shape: bf16[512,512], index: 5, kind: input, shape index: {}]   ;;  %s3566_s6 = inlined_call_operand.vmem [shape: f32[1,512], index: 6, kind: input, shape index: {}]   ;;  %s3567_s7 = inlined_call_operand.vmem [shape: bf16[512,128], index: 7, kind: input, shape index: {}]   ;;  %s3568_s8 = inlined_call_operand.vmem [shape: f32[1,8], index: 8, kind: input, shape index: {}]   ;;  %s3569_s9 = inlined_call_operand.vmem [shape: f32[8,8], index: 9, kind: output, shape index: {}]  }
   0x1   :  { %15 = vsyncpa [#allocation5], 0  ;;  %s3318_s30 = smov [#allocation2]   ;;  %s3270_s13 = scalar_lea.hbm %s3563_s3, 16384 }
   0x2   :  { %s27_s10 = sshll.u32 %s3318_s30, 4  ;;  %p3271_p0 = scmp.ne.s32.totalorder %s3563_s3, %s3270_s13  ;;  %s28_s10 = int_to_ptr.vmem [resolvable:$true] %s27_s10 }
   0x3   :  { %p3274_p1 = scmp.lt.u32.totalorder %s3270_s13, %s3563_s3 }
   0x5   :  { %p3276_p2 = pnand %p3274_p1, %p3271_p0 }
   0x7   :  { %3279 = shalt.err (!%p3276_p2)
}
   0x8   :  { %s3280_s18 = scalar_lea.vmem %s28_s10, 16384  ;;  %p3285_p4 = scmp.lt.s32.totalorder %s28_s10, %s28_s10 }
   0x9   :  { %p3281_p3 = scmp.ne.s32.totalorder %s28_s10, %s3280_s18  ;;  %p3286_p5 = scmp.lt.s32.totalorder %s3280_s18, %s3280_s18 }
   0xb   :  { %p3287_p6 = por %p3286_p5, %p3285_p4 }
   0xd   :  { %p3288_p7 = pnand %p3287_p6, %p3281_p3 }
   0xf   :  { %3291 = shalt.err (!%p3288_p7)
}
  0x10   :  { %s3319_s19 = smov 256   ;;  %s3320_s20 = smov 16  }
  0x11   :  { %33 = dma.hbm_to_vmem [thread:$0]  %s3563_s3, 16384, %s28_s10, [#allocation3], %s3319_s19, %s3319_s19, %s3320_s20  }
  0x12   :  { %s3321_s23 = smov [#allocation4]   ;;  %s3292_s27 = scalar_lea.hbm %s3565_s5, 16384 }
  0x13   :  { %s41_s24 = sshll.u32 %s3321_s23, 4  ;;  %p3293_p8 = scmp.ne.s32.totalorder %s3565_s5, %s3292_s27  ;;  %s42_s24 = int_to_ptr.vmem [resolvable:$true] %s41_s24 }
  0x14   :  { %p3296_p9 = scmp.lt.u32.totalorder %s3292_s27, %s3565_s5 }
  0x16   :  { %p3298_p10 = pnand %p3296_p9, %p3293_p8 }
  0x18   :  { %3301 = shalt.err (!%p3298_p10)
}
  0x19   :  { %s3302_s12 = scalar_lea.vmem %s42_s24, 16384  ;;  %p3307_p12 = scmp.lt.s32.totalorder %s42_s24, %s42_s24 }
  0x1a   :  { %p3303_p11 = scmp.ne.s32.totalorder %s42_s24, %s3302_s12  ;;  %p3308_p13 = scmp.lt.s32.totalorder %s3302_s12, %s3302_s12 }
  0x1c   :  { %p3309_p0 = por %p3308_p13, %p3307_p12 }
  0x1e   :  { %p3310_p1 = pnand %p3309_p0, %p3303_p11 }
  0x20   :  { %3313 = shalt.err (!%p3310_p1)
}
  0x21   :  { %47 = dma.hbm_to_vmem [thread:$0]  %s3565_s5, 16384, %s42_s24, [#allocation5], %s3319_s19, %s3319_s19, %s3320_s20  }
  0x22   :  { %3314 = dma.done.wait [#allocation3], 16384  }
  0x23   :  { %3315 = vsyncadd [#allocation3], 4294950912 }
  0x24   :  { %3316 = dma.done.wait [#allocation5], 16384  }
  0x25   :  { %3317 = vsyncadd [#allocation5], 4294950912  ;;  %v65_v0 = vlaneseq  ;;  %v3322_v1 = vmov 1983009808   ;;  %v3323_v3 = vmov 0   ;;  %v62_v7 = vld [vmem:[%s3561_s1] sm:$0xff] }
  0x26   :  { %v88_v2 = vunpack.c.l.s4 %v3322_v1  ;;  %152 = vmatprep.mubr.bf16.mxu0 %v3323_v3  ;;  %193 = vmatprep.mubr.bf16.mxu1 %v3323_v3  ;;  %vm107_vm0 = vcmask 1041408   ;;  %v86_v9 = vcombine.high %v62_v7, %v62_v7  ;;  %v2856_v13 = vld [vmem:[#allocation2 + $0x4] ss:$16 sps:$4 sm:$0xff]   ;;  %v61_v14 = vld [vmem:[%s3560_s0] sm:$0xf]  ;;  %vm103_vm1 = vcmask 31744  }
  0x27   :  { %v3398_v4 = vshrl.u32 %v65_v0, 7  ;;  %v2859_v17 = vld [vmem:[#allocation2 + $0xc] ss:$16 sps:$4 sm:$0xff]   ;;  %v2854_v18 = vld [vmem:[#allocation2] ss:$16 sps:$4 sm:$0xff]   ;;  %vm2478_vm2 = vcmask 64512  }
  0x28   :  { %v89_v5 = vunpack.c.0.s8 %v88_v2  ;;  %v2862_v19 = vld [vmem:[#allocation2 + $0x24] ss:$16 sps:$4 sm:$0xff]   ;;  %v2857_v20 = vld [vmem:[#allocation2 + $0x8] ss:$16 sps:$4 sm:$0xff]   ;;  %v2865_v21 = vld [vmem:[#allocation2 + $0x2c] ss:$16 sps:$4 sm:$0xff]  }
  0x29   :  { %v2860_v22 = vld [vmem:[#allocation2 + $0x20] ss:$16 sps:$4 sm:$0xff]   ;;  %v2868_v23 = vld [vmem:[#allocation2 + $0x44] ss:$16 sps:$4 sm:$0xff]   ;;  %v2863_v24 = vld [vmem:[#allocation2 + $0x28] ss:$16 sps:$4 sm:$0xff]  }
  0x2a   :  { %v92_v6 = vsub.s32 %v89_v5, %v3398_v4  ;;  %v2871_v25 = vld [vmem:[#allocation2 + $0x4c] ss:$16 sps:$4 sm:$0xff]   ;;  %v2866_v26 = vld [vmem:[#allocation2 + $0x40] ss:$16 sps:$4 sm:$0xff]   ;;  %v2874_v27 = vld [vmem:[#allocation2 + $0x64] ss:$16 sps:$4 sm:$0xff]  }
  0x2b   :  { %v2869_v28 = vld [vmem:[#allocation2 + $0x48] ss:$16 sps:$4 sm:$0xff]   ;;  %v2877_v29 = vld [vmem:[#allocation2 + $0x6c] ss:$16 sps:$4 sm:$0xff]   ;;  %v2872_v30 = vld [vmem:[#allocation2 + $0x60] ss:$16 sps:$4 sm:$0xff]  }
  0x2c   :  { %v93_v8 = vrot.slane %v62_v7, %v92_v6  ;;  %v100_v12 = vrot.slane %v86_v9, %v92_v6  ;;  %v2880_v31 = vld [vmem:[#allocation2 + $0x84] ss:$16 sps:$4 sm:$0xff]   ;;  %v2875_v32 = vld [vmem:[#allocation2 + $0x68] ss:$16 sps:$4 sm:$0xff]   ;;  %v2883_v33 = vld [vmem:[#allocation2 + $0x8c] ss:$16 sps:$4 sm:$0xff]  }
  0x2d   :  { %v2878_v34 = vld [vmem:[#allocation2 + $0x80] ss:$16 sps:$4 sm:$0xff]   ;;  %v2886_v35 = vld [vmem:[#allocation2 + $0xa4] ss:$16 sps:$4 sm:$0xff]   ;;  %v2881_v36 = vld [vmem:[#allocation2 + $0x88] ss:$16 sps:$4 sm:$0xff]  }
  0x2e   :  { %v101_v10 = vcombine.high %v93_v8, %v93_v8  ;;  %v109_v11 = vsel %vm107_vm0, %v93_v8, 0  ;;  %v102_v15 = vcombine.high %v100_v12, %v100_v12  ;;  %v115_v16 = vsel %vm107_vm0, %v100_v12, 0  ;;  %v2889_v37 = vld [vmem:[#allocation2 + $0xac] ss:$16 sps:$4 sm:$0xff]   ;;  %v2884_v38 = vld [vmem:[#allocation2 + $0xa0] ss:$16 sps:$4 sm:$0xff]  }
  0x2f   :  { %v2892_v39 = vld [vmem:[#allocation2 + $0xc4] ss:$16 sps:$4 sm:$0xff]   ;;  %v2887_v40 = vld [vmem:[#allocation2 + $0xa8] ss:$16 sps:$4 sm:$0xff]   ;;  %v2895_v41 = vld [vmem:[#allocation2 + $0xcc] ss:$16 sps:$4 sm:$0xff]  }
  0x30   :  { %2486 = vmatprep.subr.msk.bf16.mxu0 %vm107_vm0, %v101_v10  ;;  %2488 = vmatprep.subr.msk.bf16.mxu1 %vm107_vm0, %v102_v15  ;;  %v2890_v42 = vld [vmem:[#allocation2 + $0xc0] ss:$16 sps:$4 sm:$0xff]   ;;  %v2898_v43 = vld [vmem:[#allocation2 + $0xe4] ss:$16 sps:$4 sm:$0xff]   ;;  %v2893_v44 = vld [vmem:[#allocation2 + $0xc8] ss:$16 sps:$4 sm:$0xff]  }
  0x31   :  { %121 = vmatpush1.bf16.msra.mxu0 %v109_v11  ;;  %162 = vmatpush1.bf16.msra.mxu1 %v115_v16  ;;  %v2901_v45 = vld [vmem:[#allocation2 + $0xec] ss:$16 sps:$4 sm:$0xff]   ;;  %v2896_v46 = vld [vmem:[#allocation2 + $0xe0] ss:$16 sps:$4 sm:$0xff]   ;;  %v2904_v47 = vld [vmem:[#allocation2 + $0x104] ss:$16 sps:$4 sm:$0xff]  }
  0x32   :  { %1000 = vmatprep.subr.bf16.mxu0 %v2856_v13  ;;  %1082 = vmatprep.subr.bf16.mxu1 %v2859_v17  ;;  %v2899_v48 = vld [vmem:[#allocation2 + $0xe8] ss:$16 sps:$4 sm:$0xff]   ;;  %v2902_v49 = vld [vmem:[#allocation2 + $0x100] ss:$16 sps:$4 sm:$0xff]   ;;  %v2907_v50 = vld [vmem:[#allocation2 + $0x10c] ss:$16 sps:$4 sm:$0xff]  }
  0x33   :  { %v2905_v51 = vld [vmem:[#allocation2 + $0x108] ss:$16 sps:$4 sm:$0xff]   ;;  %v2910_v52 = vld [vmem:[#allocation2 + $0x124] ss:$16 sps:$4 sm:$0xff]   ;;  %v2913_v53 = vld [vmem:[#allocation2 + $0x12c] ss:$16 sps:$4 sm:$0xff]  }
  0x34   :  { %2487 = vmatmul.mubr.msk.bf16.vlgmr.msra.gmra.mrb[0].mxu0 %vm103_vm1, %v61_v14  ;;  %2489 = vmatmul.mubr.msk.bf16.vlgmr.msra.gmra.mrb[0].mxu1 %vm103_vm1, %v61_v14  ;;  %v2908_v54 = vld [vmem:[#allocation2 + $0x120] ss:$16 sps:$4 sm:$0xff]   ;;  %v2916_v55 = vld [vmem:[#allocation2 + $0x144] ss:$16 sps:$4 sm:$0xff]   ;;  %v2911_v56 = vld [vmem:[#allocation2 + $0x128] ss:$16 sps:$4 sm:$0xff]  }
  0x35   :  { %1001 = vmatpush1.bf16.msra.mxu0 %v2854_v18  ;;  %1083 = vmatpush1.bf16.msra.mxu1 %v2857_v20  ;;  %v2919_v57 = vld [vmem:[#allocation2 + $0x14c] ss:$16 sps:$4 sm:$0xff]   ;;  %v2914_v58 = vld [vmem:[#allocation2 + $0x140] ss:$16 sps:$4 sm:$0xff]   ;;  %v2922_v59 = vld [vmem:[#allocation2 + $0x164] ss:$16 sps:$4 sm:$0xff]  }
  0x36   :  { %1002 = vmatprep.subr.bf16.mxu0 %v2862_v19  ;;  %1084 = vmatprep.subr.bf16.mxu1 %v2865_v21  ;;  %v2917_v60 = vld [vmem:[#allocation2 + $0x148] ss:$16 sps:$4 sm:$0xff]   ;;  %v2925_v61 = vld [vmem:[#allocation2 + $0x16c] ss:$16 sps:$4 sm:$0xff]   ;;  %v2920_v62 = vld [vmem:[#allocation2 + $0x160] ss:$16 sps:$4 sm:$0xff]  }
  0x37   :  { %v2928_v63 = vld [vmem:[#allocation2 + $0x184] ss:$16 sps:$4 sm:$0xff]   ;;  %v2923_v0 = vld [vmem:[#allocation2 + $0x168] ss:$16 sps:$4 sm:$0xff]   ;;  %v2931_v1 = vld [vmem:[#allocation2 + $0x18c] ss:$16 sps:$4 sm:$0xff]  }
  0x38   :  { %v2926_v2 = vld [vmem:[#allocation2 + $0x180] ss:$16 sps:$4 sm:$0xff]   ;;  %v2934_v3 = vld [vmem:[#allocation2 + $0x1a4] ss:$16 sps:$4 sm:$0xff]   ;;  %v2929_v5 = vld [vmem:[#allocation2 + $0x188] ss:$16 sps:$4 sm:$0xff]  }
  0x39   :  { %1003 = vmatpush1.bf16.msra.mxu0 %v2860_v22  ;;  %1085 = vmatpush1.bf16.msra.mxu1 %v2863_v24  ;;  %v2937_v6 = vld [vmem:[#allocation2 + $0x1ac] ss:$16 sps:$4 sm:$0xff]   ;;  %v2932_v7 = vld [vmem:[#allocation2 + $0x1a0] ss:$16 sps:$4 sm:$0xff]   ;;  %v2935_v8 = vld [vmem:[#allocation2 + $0x1a8] ss:$16 sps:$4 sm:$0xff]  }
  0x3a   :  { %1004 = vmatprep.subr.bf16.mxu0 %v2868_v23  ;;  %1086 = vmatprep.subr.bf16.mxu1 %v2871_v25  ;;  %v2940_v9 = vld [vmem:[#allocation2 + $0x1c4] ss:$16 sps:$4 sm:$0xff]   ;;  %v2943_v10 = vld [vmem:[#allocation2 + $0x1cc] ss:$16 sps:$4 sm:$0xff]   ;;  %v2938_v11 = vld [vmem:[#allocation2 + $0x1c0] ss:$16 sps:$4 sm:$0xff]  }
  0x3b   :  { %v2941_v12 = vld [vmem:[#allocation2 + $0x1c8] ss:$16 sps:$4 sm:$0xff]   ;;  %v2946_v13 = vld [vmem:[#allocation2 + $0x1e4] ss:$16 sps:$4 sm:$0xff]   ;;  %v2949_v14 = vld [vmem:[#allocation2 + $0x1ec] ss:$16 sps:$4 sm:$0xff]  }
  0x3c   :  { %v2944_v15 = vld [vmem:[#allocation2 + $0x1e0] ss:$16 sps:$4 sm:$0xff]   ;;  %v2947_v16 = vld [vmem:[#allocation2 + $0x1e8] ss:$16 sps:$4 sm:$0xff]   ;;  %v2952_v17 = vld [vmem:[#allocation2 + $0x204] ss:$16 sps:$4 sm:$0xff]  }
  0x3d   :  { %1005 = vmatpush1.bf16.msra.mxu0 %v2866_v26  ;;  %1087 = vmatpush1.bf16.msra.mxu1 %v2869_v28  ;;  %v2955_v18 = vld [vmem:[#allocation2 + $0x20c] ss:$16 sps:$4 sm:$0xff]   ;;  %v3408_v19 = vsub.s32 0, %v3398_v4  ;;  %v3413_v20 = vld [vmem:[%s3562_s2] sm:$0xf]  ;;  %v3416_v21 = vsub.s32 1, %v3398_v4 }
  0x3e   :  { %1006 = vmatprep.subr.bf16.mxu0 %v2874_v27  ;;  %1088 = vmatprep.subr.bf16.mxu1 %v2877_v29  ;;  %v3419_v22 = vsub.s32 3, %v3398_v4 }
  0x3f   :  { %v68_v23 = vrot.slane %v3413_v20, %v3408_v19  ;;  %v72_v24 = vrot.slane %v3413_v20, %v3416_v21 }
  0x40   :  { %v80_v26 = vrot.slane %v3413_v20, %v3419_v22 }
  0x41   :  { %1007 = vmatpush1.bf16.msra.mxu0 %v2872_v30  ;;  %1089 = vmatpush1.bf16.msra.mxu1 %v2875_v32 }
  0x42   :  { %1008 = vmatprep.subr.bf16.mxu0 %v2880_v31  ;;  %1090 = vmatprep.subr.bf16.mxu1 %v2883_v33 }
  0x45   :  { %1009 = vmatpush1.bf16.msra.mxu0 %v2878_v34  ;;  %1091 = vmatpush1.bf16.msra.mxu1 %v2881_v36 }
  0x46   :  { %1010 = vmatprep.subr.bf16.mxu0 %v2886_v35  ;;  %1092 = vmatprep.subr.bf16.mxu1 %v2889_v37 }
  0x49   :  { %1011 = vmatpush1.bf16.msra.mxu0 %v2884_v38  ;;  %1093 = vmatpush1.bf16.msra.mxu1 %v2887_v40  ;;  %v2950_v40 = vld [vmem:[#allocation2 + $0x200] ss:$16 sps:$4 sm:$0xff]  }
  0x4a   :  { %1012 = vmatprep.subr.bf16.mxu0 %v2892_v39  ;;  %1094 = vmatprep.subr.bf16.mxu1 %v2895_v41  ;;  %v2953_v41 = vld [vmem:[#allocation2 + $0x208] ss:$16 sps:$4 sm:$0xff]  }
  0x4d   :  { %1013 = vmatpush1.bf16.msra.mxu0 %v2890_v42  ;;  %1095 = vmatpush1.bf16.msra.mxu1 %v2893_v44  ;;  %v2958_v44 = vld [vmem:[#allocation2 + $0x224] ss:$16 sps:$4 sm:$0xff]  }
  0x4e   :  { %1014 = vmatprep.subr.bf16.mxu0 %v2898_v43  ;;  %1096 = vmatprep.subr.bf16.mxu1 %v2901_v45  ;;  %v2961_v45 = vld [vmem:[#allocation2 + $0x22c] ss:$16 sps:$4 sm:$0xff]  }
  0x51   :  { %1015 = vmatpush1.bf16.msra.mxu0 %v2896_v46  ;;  %1097 = vmatpush1.bf16.msra.mxu1 %v2899_v48  ;;  %v2959_v48 = vld [vmem:[#allocation2 + $0x228] ss:$16 sps:$4 sm:$0xff]  }
  0x52   :  { %1016 = vmatprep.subr.bf16.mxu0 %v2904_v47  ;;  %1098 = vmatprep.subr.bf16.mxu1 %v2907_v50  ;;  %v2956_v47 = vld [vmem:[#allocation2 + $0x220] ss:$16 sps:$4 sm:$0xff]   ;;  %v2967_v50 = vld [vmem:[#allocation2 + $0x24c] ss:$16 sps:$4 sm:$0xff]  }
  0x55   :  { %1017 = vmatpush1.bf16.msra.mxu0 %v2902_v49  ;;  %1099 = vmatpush1.bf16.msra.mxu1 %v2905_v51  ;;  %v2964_v49 = vld [vmem:[#allocation2 + $0x244] ss:$16 sps:$4 sm:$0xff]   ;;  %v2962_v51 = vld [vmem:[#allocation2 + $0x240] ss:$16 sps:$4 sm:$0xff]  }
  0x56   :  { %1018 = vmatprep.subr.bf16.mxu0 %v2910_v52  ;;  %1100 = vmatprep.subr.bf16.mxu1 %v2913_v53  ;;  %v2965_v52 = vld [vmem:[#allocation2 + $0x248] ss:$16 sps:$4 sm:$0xff]   ;;  %v2970_v53 = vld [vmem:[#allocation2 + $0x264] ss:$16 sps:$4 sm:$0xff]  }
  0x59   :  { %1019 = vmatpush1.bf16.msra.mxu0 %v2908_v54  ;;  %1101 = vmatpush1.bf16.msra.mxu1 %v2911_v56  ;;  %v2973_v54 = vld [vmem:[#allocation2 + $0x26c] ss:$16 sps:$4 sm:$0xff]   ;;  %v2971_v56 = vld [vmem:[#allocation2 + $0x268] ss:$16 sps:$4 sm:$0xff]  }
  0x5a   :  { %1020 = vmatprep.subr.bf16.mxu0 %v2916_v55  ;;  %1102 = vmatprep.subr.bf16.mxu1 %v2919_v57  ;;  %v2968_v55 = vld [vmem:[#allocation2 + $0x260] ss:$16 sps:$4 sm:$0xff]   ;;  %v2976_v57 = vld [vmem:[#allocation2 + $0x284] ss:$16 sps:$4 sm:$0xff]  }
  0x5d   :  { %1021 = vmatpush1.bf16.msra.mxu0 %v2914_v58  ;;  %1103 = vmatpush1.bf16.msra.mxu1 %v2917_v60  ;;  %v2979_v58 = vld [vmem:[#allocation2 + $0x28c] ss:$16 sps:$4 sm:$0xff]   ;;  %v2977_v60 = vld [vmem:[#allocation2 + $0x288] ss:$16 sps:$4 sm:$0xff]  }
  0x5e   :  { %1022 = vmatprep.subr.bf16.mxu0 %v2922_v59  ;;  %1104 = vmatprep.subr.bf16.mxu1 %v2925_v61  ;;  %v2974_v59 = vld [vmem:[#allocation2 + $0x280] ss:$16 sps:$4 sm:$0xff]   ;;  %v2982_v61 = vld [vmem:[#allocation2 + $0x2a4] ss:$16 sps:$4 sm:$0xff]  }
  0x61   :  { %1023 = vmatpush1.bf16.msra.mxu0 %v2920_v62  ;;  %1105 = vmatpush1.bf16.msra.mxu1 %v2923_v0  ;;  %v2985_v62 = vld [vmem:[#allocation2 + $0x2ac] ss:$16 sps:$4 sm:$0xff]   ;;  %v2983_v0 = vld [vmem:[#allocation2 + $0x2a8] ss:$16 sps:$4 sm:$0xff]  }
  0x62   :  { %1024 = vmatprep.subr.bf16.mxu0 %v2928_v63  ;;  %1106 = vmatprep.subr.bf16.mxu1 %v2931_v1  ;;  %v2980_v63 = vld [vmem:[#allocation2 + $0x2a0] ss:$16 sps:$4 sm:$0xff]   ;;  %v2988_v1 = vld [vmem:[#allocation2 + $0x2c4] ss:$16 sps:$4 sm:$0xff]  }
  0x65   :  { %1025 = vmatpush1.bf16.msra.mxu0 %v2926_v2  ;;  %1107 = vmatpush1.bf16.msra.mxu1 %v2929_v5  ;;  %v2991_v2 = vld [vmem:[#allocation2 + $0x2cc] ss:$16 sps:$4 sm:$0xff]   ;;  %v2989_v5 = vld [vmem:[#allocation2 + $0x2c8] ss:$16 sps:$4 sm:$0xff]  }
  0x66   :  { %1026 = vmatprep.subr.bf16.mxu0 %v2934_v3  ;;  %1108 = vmatprep.subr.bf16.mxu1 %v2937_v6  ;;  %v2986_v3 = vld [vmem:[#allocation2 + $0x2c0] ss:$16 sps:$4 sm:$0xff]   ;;  %v2994_v6 = vld [vmem:[#allocation2 + $0x2e4] ss:$16 sps:$4 sm:$0xff]  }
  0x69   :  { %1027 = vmatpush1.bf16.msra.mxu0 %v2932_v7  ;;  %1109 = vmatpush1.bf16.msra.mxu1 %v2935_v8  ;;  %v2997_v7 = vld [vmem:[#allocation2 + $0x2ec] ss:$16 sps:$4 sm:$0xff]   ;;  %v2992_v8 = vld [vmem:[#allocation2 + $0x2e0] ss:$16 sps:$4 sm:$0xff]  }
  0x6a   :  { %1028 = vmatprep.subr.bf16.mxu0 %v2940_v9  ;;  %1110 = vmatprep.subr.bf16.mxu1 %v2943_v10  ;;  %v2995_v9 = vld [vmem:[#allocation2 + $0x2e8] ss:$16 sps:$4 sm:$0xff]   ;;  %v3000_v10 = vld [vmem:[#allocation2 + $0x304] ss:$16 sps:$4 sm:$0xff]  }
  0x6d   :  { %1029 = vmatpush1.bf16.msra.mxu0 %v2938_v11  ;;  %1111 = vmatpush1.bf16.msra.mxu1 %v2941_v12  ;;  %v3003_v11 = vld [vmem:[#allocation2 + $0x30c] ss:$16 sps:$4 sm:$0xff]   ;;  %v2998_v12 = vld [vmem:[#allocation2 + $0x300] ss:$16 sps:$4 sm:$0xff]  }
  0x6e   :  { %1030 = vmatprep.subr.bf16.mxu0 %v2946_v13  ;;  %1112 = vmatprep.subr.bf16.mxu1 %v2949_v14  ;;  %v3001_v13 = vld [vmem:[#allocation2 + $0x308] ss:$16 sps:$4 sm:$0xff]   ;;  %v3006_v14 = vld [vmem:[#allocation2 + $0x324] ss:$16 sps:$4 sm:$0xff]  }
  0x71   :  { %1031 = vmatpush1.bf16.msra.mxu0 %v2944_v15  ;;  %1113 = vmatpush1.bf16.msra.mxu1 %v2947_v16  ;;  %v3009_v15 = vld [vmem:[#allocation2 + $0x32c] ss:$16 sps:$4 sm:$0xff]   ;;  %v3004_v16 = vld [vmem:[#allocation2 + $0x320] ss:$16 sps:$4 sm:$0xff]  }
  0x72   :  { %1041 = vmatprep.subr.bf16.mxu0 %v2952_v17  ;;  %1123 = vmatprep.subr.bf16.mxu1 %v2955_v18  ;;  %v3007_v17 = vld [vmem:[#allocation2 + $0x328] ss:$16 sps:$4 sm:$0xff]   ;;  %v3012_v18 = vld [vmem:[#allocation2 + $0x344] ss:$16 sps:$4 sm:$0xff]  }
 0x107   :  { %v154_v25 = vpop.f32.mrb[0].mxu0  ;;  %v3427_v31 = vpop.f32.mrb[0].mxu1 }
 0x108   :  { %v155_v27 = vadd.f32 %v154_v25, %v68_v23  ;;  %v156_v28 = vpop.f32.mrb[1].mxu0  ;;  %v197_v34 = vpop.f32.mrb[1].mxu1  ;;  %v3015_v23 = vld [vmem:[#allocation2 + $0x34c] ss:$16 sps:$4 sm:$0xff]   ;;  %v3013_v25 = vld [vmem:[#allocation2 + $0x348] ss:$16 sps:$4 sm:$0xff]  }
 0x109   :  { %v157_v29 = vadd.f32 %v156_v28, %v72_v24  ;;  %v158_v30 = vpop.f32.mrb[2].mxu0  ;;  %v198_v36 = vadd.f32 %v197_v34, %v80_v26  ;;  %v199_v37 = vpop.f32.mrb[2].mxu1  ;;  %v3010_v24 = vld [vmem:[#allocation2 + $0x340] ss:$16 sps:$4 sm:$0xff]   ;;  %v3018_v26 = vld [vmem:[#allocation2 + $0x364] ss:$16 sps:$4 sm:$0xff]  }
 0x10a   :  { %v202_v32 = vmax.f32 %v155_v27, 0.0  ;;  %v159_v33 = vpop.f32.mrb[3].mxu0  ;;  %v200_v38 = vpop.f32.mrb[3].mxu1  ;;  %v3021_v27 = vld [vmem:[#allocation2 + $0x36c] ss:$16 sps:$4 sm:$0xff]  }
 0x10b   :  { %v203_v35 = vmax.f32 %v157_v29, 0.0  ;;  %v205_v42 = vmax.f32 %v198_v36, 0.0  ;;  %v3016_v28 = vld [vmem:[#allocation2 + $0x360] ss:$16 sps:$4 sm:$0xff]   ;;  %v3019_v29 = vld [vmem:[#allocation2 + $0x368] ss:$16 sps:$4 sm:$0xff]  }
 0x10c   :  { %v206_v43 = vpack.c.bf16 %v202_v32, %v202_v32  ;;  %v3024_v30 = vld [vmem:[#allocation2 + $0x384] ss:$16 sps:$4 sm:$0xff]   ;;  %v3027_v32 = vld [vmem:[#allocation2 + $0x38c] ss:$16 sps:$4 sm:$0xff]   ;;  %v3022_v33 = vld [vmem:[#allocation2 + $0x380] ss:$16 sps:$4 sm:$0xff]  }
 0x10d   :  { %v207_v39 = vpack.c.bf16 %v203_v35, %v203_v35  ;;  %v209_v46 = vpack.c.bf16 %v205_v42, %v205_v42  ;;  %v3025_v34 = vld [vmem:[#allocation2 + $0x388] ss:$16 sps:$4 sm:$0xff]   ;;  %v3430_v35 = vsub.s32 2, %v3398_v4  ;;  %v3030_v36 = vld [vmem:[#allocation2 + $0x3a4] ss:$16 sps:$4 sm:$0xff]  }
 0x10e   :  { %v3033_v37 = vld [vmem:[#allocation2 + $0x3ac] ss:$16 sps:$4 sm:$0xff]   ;;  %v3028_v38 = vld [vmem:[#allocation2 + $0x3a0] ss:$16 sps:$4 sm:$0xff]  }
 0x10f   :  { %1032 = vmatprep.mubr.bf16.mxu0 %v207_v39  ;;  %1114 = vmatprep.mubr.bf16.mxu1 %v207_v39  ;;  %v3031_v39 = vld [vmem:[#allocation2 + $0x3a8] ss:$16 sps:$4 sm:$0xff]   ;;  %v3039_v42 = vld [vmem:[#allocation2 + $0x3cc] ss:$16 sps:$4 sm:$0xff]  }
 0x110   :  { %1033 = vmatmul.mubr.bf16.vlgmr.msra.gmra.mrb[4].mxu0 %v206_v43  ;;  %1115 = vmatmul.mubr.bf16.vlgmr.msra.gmra.mrb[4].mxu1 %v206_v43  ;;  %v3034_v43 = vld [vmem:[#allocation2 + $0x3c0] ss:$16 sps:$4 sm:$0xff]  }
 0x111   :  { %1042 = vmatpush1.bf16.msra.mxu0 %v2950_v40  ;;  %1124 = vmatpush1.bf16.msra.mxu1 %v2953_v41  ;;  %v76_v40 = vrot.slane %v3413_v20, %v3430_v35  ;;  %v3036_v41 = vld [vmem:[#allocation2 + $0x3c4] ss:$16 sps:$4 sm:$0xff]  }
 0x112   :  { %1043 = vmatprep.subr.bf16.mxu0 %v2958_v44  ;;  %1125 = vmatprep.subr.bf16.mxu1 %v2961_v45  ;;  %v3037_v44 = vld [vmem:[#allocation2 + $0x3c8] ss:$16 sps:$4 sm:$0xff]   ;;  %v3042_v45 = vld [vmem:[#allocation2 + $0x3e4] ss:$16 sps:$4 sm:$0xff]  }
 0x113   :  { %1073 = vmatprep.mubr.bf16.mxu0 %v209_v46  ;;  %1155 = vmatprep.mubr.bf16.mxu1 %v209_v46  ;;  %v196_v4 = vadd.f32 %v3427_v31, %v76_v40  ;;  %v3045_v46 = vld [vmem:[#allocation2 + $0x3ec] ss:$16 sps:$4 sm:$0xff]   ;;  %v3048_v20 = vld [vmem:[#allocation4 + $0x4] ss:$16 sps:$4 sm:$0xff]  }
 0x114   :  { %v3054_v31 = vld [vmem:[#allocation4 + $0x24] ss:$16 sps:$4 sm:$0xff]  }
 0x115   :  { %1044 = vmatpush1.bf16.msra.mxu0 %v2956_v47  ;;  %1126 = vmatpush1.bf16.msra.mxu1 %v2959_v48  ;;  %v3040_v47 = vld [vmem:[#allocation2 + $0x3e0] ss:$16 sps:$4 sm:$0xff]   ;;  %v3043_v48 = vld [vmem:[#allocation2 + $0x3e8] ss:$16 sps:$4 sm:$0xff]   ;;  %v3120_v40 = vld [vmem:[#allocation4 + $0x184] ss:$16 sps:$4 sm:$0xff]  }
 0x116   :  { %1045 = vmatprep.subr.bf16.mxu0 %v2964_v49  ;;  %1127 = vmatprep.subr.bf16.mxu1 %v2967_v50  ;;  %v204_v49 = vmax.f32 %v196_v4, 0.0  ;;  %v3051_v50 = vld [vmem:[#allocation4 + $0xc] ss:$16 sps:$4 sm:$0xff]  }
 0x117   :  { %v3129_v4 = vld [vmem:[#allocation4 + $0x1ac] ss:$16 sps:$4 sm:$0xff]  }
 0x119   :  { %1046 = vmatpush1.bf16.msra.mxu0 %v2962_v51  ;;  %1128 = vmatpush1.bf16.msra.mxu1 %v2965_v52  ;;  %v3046_v51 = vld [vmem:[#allocation4] ss:$16 sps:$4 sm:$0xff]   ;;  %v3049_v52 = vld [vmem:[#allocation4 + $0x8] ss:$16 sps:$4 sm:$0xff]  }
 0x11a   :  { %1047 = vmatprep.subr.bf16.mxu0 %v2970_v53  ;;  %1129 = vmatprep.subr.bf16.mxu1 %v2973_v54  ;;  %v208_v53 = vpack.c.bf16 %v204_v49, %v204_v49  ;;  %v3057_v54 = vld [vmem:[#allocation4 + $0x2c] ss:$16 sps:$4 sm:$0xff]   ;;  %v3130_v49 = vld [vmem:[#allocation4 + $0x1c0] ss:$16 sps:$4 sm:$0xff]  }
 0x11d   :  { %1048 = vmatpush1.bf16.msra.mxu0 %v2968_v55  ;;  %1130 = vmatpush1.bf16.msra.mxu1 %v2971_v56  ;;  %v3052_v55 = vld [vmem:[#allocation4 + $0x20] ss:$16 sps:$4 sm:$0xff]   ;;  %v3055_v56 = vld [vmem:[#allocation4 + $0x28] ss:$16 sps:$4 sm:$0xff]  }
 0x11e   :  { %1049 = vmatprep.subr.bf16.mxu0 %v2976_v57  ;;  %1131 = vmatprep.subr.bf16.mxu1 %v2979_v58  ;;  %v3060_v57 = vld [vmem:[#allocation4 + $0x44] ss:$16 sps:$4 sm:$0xff]   ;;  %v3063_v58 = vld [vmem:[#allocation4 + $0x4c] ss:$16 sps:$4 sm:$0xff]  }
 0x121   :  { %1050 = vmatpush1.bf16.msra.mxu0 %v2974_v59  ;;  %1132 = vmatpush1.bf16.msra.mxu1 %v2977_v60  ;;  %v3058_v59 = vld [vmem:[#allocation4 + $0x40] ss:$16 sps:$4 sm:$0xff]   ;;  %v3061_v60 = vld [vmem:[#allocation4 + $0x48] ss:$16 sps:$4 sm:$0xff]  }
 0x122   :  { %1051 = vmatprep.subr.bf16.mxu0 %v2982_v61  ;;  %1133 = vmatprep.subr.bf16.mxu1 %v2985_v62  ;;  %v3066_v61 = vld [vmem:[#allocation4 + $0x64] ss:$16 sps:$4 sm:$0xff]   ;;  %v3069_v62 = vld [vmem:[#allocation4 + $0x6c] ss:$16 sps:$4 sm:$0xff]  }
 0x125   :  { %1052 = vmatpush1.bf16.msra.mxu0 %v2980_v63  ;;  %1134 = vmatpush1.bf16.msra.mxu1 %v2983_v0  ;;  %v3064_v63 = vld [vmem:[#allocation4 + $0x60] ss:$16 sps:$4 sm:$0xff]   ;;  %v3067_v0 = vld [vmem:[#allocation4 + $0x68] ss:$16 sps:$4 sm:$0xff]  }
 0x126   :  { %1053 = vmatprep.subr.bf16.mxu0 %v2988_v1  ;;  %1135 = vmatprep.subr.bf16.mxu1 %v2991_v2  ;;  %v3072_v1 = vld [vmem:[#allocation4 + $0x84] ss:$16 sps:$4 sm:$0xff]   ;;  %v3075_v2 = vld [vmem:[#allocation4 + $0x8c] ss:$16 sps:$4 sm:$0xff]  }
 0x129   :  { %1054 = vmatpush1.bf16.msra.mxu0 %v2986_v3  ;;  %1136 = vmatpush1.bf16.msra.mxu1 %v2989_v5  ;;  %v3070_v3 = vld [vmem:[#allocation4 + $0x80] ss:$16 sps:$4 sm:$0xff]   ;;  %v3073_v5 = vld [vmem:[#allocation4 + $0x88] ss:$16 sps:$4 sm:$0xff]  }
 0x12a   :  { %1055 = vmatprep.subr.bf16.mxu0 %v2994_v6  ;;  %1137 = vmatprep.subr.bf16.mxu1 %v2997_v7  ;;  %v3078_v6 = vld [vmem:[#allocation4 + $0xa4] ss:$16 sps:$4 sm:$0xff]   ;;  %v3081_v7 = vld [vmem:[#allocation4 + $0xac] ss:$16 sps:$4 sm:$0xff]  }
 0x12d   :  { %1056 = vmatpush1.bf16.msra.mxu0 %v2992_v8  ;;  %1138 = vmatpush1.bf16.msra.mxu1 %v2995_v9  ;;  %v3076_v8 = vld [vmem:[#allocation4 + $0xa0] ss:$16 sps:$4 sm:$0xff]   ;;  %v3079_v9 = vld [vmem:[#allocation4 + $0xa8] ss:$16 sps:$4 sm:$0xff]  }
 0x12e   :  { %1057 = vmatprep.subr.bf16.mxu0 %v3000_v10  ;;  %1139 = vmatprep.subr.bf16.mxu1 %v3003_v11  ;;  %v3084_v10 = vld [vmem:[#allocation4 + $0xc4] ss:$16 sps:$4 sm:$0xff]   ;;  %v3087_v11 = vld [vmem:[#allocation4 + $0xcc] ss:$16 sps:$4 sm:$0xff]  }
 0x131   :  { %1058 = vmatpush1.bf16.msra.mxu0 %v2998_v12  ;;  %1140 = vmatpush1.bf16.msra.mxu1 %v3001_v13  ;;  %v3082_v12 = vld [vmem:[#allocation4 + $0xc0] ss:$16 sps:$4 sm:$0xff]   ;;  %v3085_v13 = vld [vmem:[#allocation4 + $0xc8] ss:$16 sps:$4 sm:$0xff]  }
 0x132   :  { %1059 = vmatprep.subr.bf16.mxu0 %v3006_v14  ;;  %1141 = vmatprep.subr.bf16.mxu1 %v3009_v15  ;;  %v3090_v14 = vld [vmem:[#allocation4 + $0xe4] ss:$16 sps:$4 sm:$0xff]   ;;  %v3093_v15 = vld [vmem:[#allocation4 + $0xec] ss:$16 sps:$4 sm:$0xff]  }
 0x135   :  { %1060 = vmatpush1.bf16.msra.mxu0 %v3004_v16  ;;  %1142 = vmatpush1.bf16.msra.mxu1 %v3007_v17  ;;  %v3088_v16 = vld [vmem:[#allocation4 + $0xe0] ss:$16 sps:$4 sm:$0xff]   ;;  %v3091_v17 = vld [vmem:[#allocation4 + $0xe8] ss:$16 sps:$4 sm:$0xff]  }
 0x136   :  { %1061 = vmatprep.subr.bf16.mxu0 %v3012_v18  ;;  %1143 = vmatprep.subr.bf16.mxu1 %v3015_v23  ;;  %v3096_v18 = vld [vmem:[#allocation4 + $0x104] ss:$16 sps:$4 sm:$0xff]   ;;  %v3099_v23 = vld [vmem:[#allocation4 + $0x10c] ss:$16 sps:$4 sm:$0xff]  }
 0x139   :  { %1062 = vmatpush1.bf16.msra.mxu0 %v3010_v24  ;;  %1144 = vmatpush1.bf16.msra.mxu1 %v3013_v25  ;;  %v3094_v24 = vld [vmem:[#allocation4 + $0x100] ss:$16 sps:$4 sm:$0xff]   ;;  %v3097_v25 = vld [vmem:[#allocation4 + $0x108] ss:$16 sps:$4 sm:$0xff]  }
 0x13a   :  { %1063 = vmatprep.subr.bf16.mxu0 %v3018_v26  ;;  %1145 = vmatprep.subr.bf16.mxu1 %v3021_v27  ;;  %v3102_v26 = vld [vmem:[#allocation4 + $0x124] ss:$16 sps:$4 sm:$0xff]   ;;  %v3105_v27 = vld [vmem:[#allocation4 + $0x12c] ss:$16 sps:$4 sm:$0xff]  }
 0x13d   :  { %1064 = vmatpush1.bf16.msra.mxu0 %v3016_v28  ;;  %1146 = vmatpush1.bf16.msra.mxu1 %v3019_v29  ;;  %v3100_v28 = vld [vmem:[#allocation4 + $0x120] ss:$16 sps:$4 sm:$0xff]   ;;  %v3103_v29 = vld [vmem:[#allocation4 + $0x128] ss:$16 sps:$4 sm:$0xff]  }
 0x13e   :  { %1065 = vmatprep.subr.bf16.mxu0 %v3024_v30  ;;  %1147 = vmatprep.subr.bf16.mxu1 %v3027_v32  ;;  %v3108_v30 = vld [vmem:[#allocation4 + $0x144] ss:$16 sps:$4 sm:$0xff]   ;;  %v3111_v32 = vld [vmem:[#allocation4 + $0x14c] ss:$16 sps:$4 sm:$0xff]  }
 0x141   :  { %1066 = vmatpush1.bf16.msra.mxu0 %v3022_v33  ;;  %1148 = vmatpush1.bf16.msra.mxu1 %v3025_v34  ;;  %v3106_v33 = vld [vmem:[#allocation4 + $0x140] ss:$16 sps:$4 sm:$0xff]   ;;  %v3109_v34 = vld [vmem:[#allocation4 + $0x148] ss:$16 sps:$4 sm:$0xff]  }
 0x142   :  { %1067 = vmatprep.subr.bf16.mxu0 %v3030_v36  ;;  %1149 = vmatprep.subr.bf16.mxu1 %v3033_v37  ;;  %v3114_v36 = vld [vmem:[#allocation4 + $0x164] ss:$16 sps:$4 sm:$0xff]   ;;  %v3117_v37 = vld [vmem:[#allocation4 + $0x16c] ss:$16 sps:$4 sm:$0xff]  }
 0x145   :  { %1068 = vmatpush1.bf16.msra.mxu0 %v3028_v38  ;;  %1150 = vmatpush1.bf16.msra.mxu1 %v3031_v39  ;;  %v3112_v38 = vld [vmem:[#allocation4 + $0x160] ss:$16 sps:$4 sm:$0xff]   ;;  %v3115_v39 = vld [vmem:[#allocation4 + $0x168] ss:$16 sps:$4 sm:$0xff]  }
 0x146   :  { %1069 = vmatprep.subr.bf16.mxu0 %v3036_v41  ;;  %1151 = vmatprep.subr.bf16.mxu1 %v3039_v42  ;;  %v3123_v41 = vld [vmem:[#allocation4 + $0x18c] ss:$16 sps:$4 sm:$0xff]   ;;  %v3118_v42 = vld [vmem:[#allocation4 + $0x180] ss:$16 sps:$4 sm:$0xff]  }
 0x149   :  { %1070 = vmatpush1.bf16.msra.mxu0 %v3034_v43  ;;  %1152 = vmatpush1.bf16.msra.mxu1 %v3037_v44  ;;  %v3121_v43 = vld [vmem:[#allocation4 + $0x188] ss:$16 sps:$4 sm:$0xff]   ;;  %v3126_v44 = vld [vmem:[#allocation4 + $0x1a4] ss:$16 sps:$4 sm:$0xff]  }
 0x14a   :  { %1071 = vmatprep.subr.bf16.mxu0 %v3042_v45  ;;  %1153 = vmatprep.subr.bf16.mxu1 %v3045_v46  ;;  %v3124_v45 = vld [vmem:[#allocation4 + $0x1a0] ss:$16 sps:$4 sm:$0xff]   ;;  %v3127_v46 = vld [vmem:[#allocation4 + $0x1a8] ss:$16 sps:$4 sm:$0xff]  }
 0x14d   :  { %1072 = vmatpush1.bf16.msra.mxu0 %v3040_v47  ;;  %1154 = vmatpush1.bf16.msra.mxu1 %v3043_v48  ;;  %v3132_v47 = vld [vmem:[#allocation4 + $0x1c4] ss:$16 sps:$4 sm:$0xff]   ;;  %v3135_v48 = vld [vmem:[#allocation4 + $0x1cc] ss:$16 sps:$4 sm:$0xff]  }
 0x14e   :  { %1962 = vmatprep.subr.bf16.mxu0 %v3048_v20  ;;  %2044 = vmatprep.subr.bf16.mxu1 %v3051_v50  ;;  %v3133_v20 = vld [vmem:[#allocation4 + $0x1c8] ss:$16 sps:$4 sm:$0xff]   ;;  %v3138_v50 = vld [vmem:[#allocation4 + $0x1e4] ss:$16 sps:$4 sm:$0xff]  }
 0x150   :  { %1074 = vmatmul.mubr.bf16.vlgmr.msra.gmra.mrb[4].mxu0 %v208_v53  ;;  %1156 = vmatmul.mubr.bf16.vlgmr.msra.gmra.mrb[4].mxu1 %v208_v53  ;;  %v3139_v53 = vld [vmem:[#allocation4 + $0x1e8] ss:$16 sps:$4 sm:$0xff]  }
 0x151   :  { %1963 = vmatpush1.bf16.msra.mxu0 %v3046_v51  ;;  %2045 = vmatpush1.bf16.msra.mxu1 %v3049_v52  ;;  %v3141_v51 = vld [vmem:[#allocation4 + $0x1ec] ss:$16 sps:$4 sm:$0xff]   ;;  %v3136_v52 = vld [vmem:[#allocation4 + $0x1e0] ss:$16 sps:$4 sm:$0xff]  }
 0x152   :  { %1964 = vmatprep.subr.bf16.mxu0 %v3054_v31  ;;  %2046 = vmatprep.subr.bf16.mxu1 %v3057_v54  ;;  %v3144_v31 = vld [vmem:[#allocation4 + $0x204] ss:$16 sps:$4 sm:$0xff]   ;;  %v3147_v54 = vld [vmem:[#allocation4 + $0x20c] ss:$16 sps:$4 sm:$0xff]  }
 0x155   :  { %1965 = vmatpush1.bf16.msra.mxu0 %v3052_v55  ;;  %2047 = vmatpush1.bf16.msra.mxu1 %v3055_v56  ;;  %v3438_v55 = vld [vmem:[%s3564_s4] sm:$0xf] }
 0x156   :  { %1966 = vmatprep.subr.bf16.mxu0 %v3060_v57  ;;  %2048 = vmatprep.subr.bf16.mxu1 %v3063_v58  ;;  %v343_v56 = vrot.slane %v3438_v55, %v3408_v19  ;;  %v347_v57 = vrot.slane %v3438_v55, %v3416_v21  ;;  %v355_v58 = vrot.slane %v3438_v55, %v3419_v22 }
 0x159   :  { %1967 = vmatpush1.bf16.msra.mxu0 %v3058_v59  ;;  %2049 = vmatpush1.bf16.msra.mxu1 %v3061_v60 }
 0x15a   :  { %1968 = vmatprep.subr.bf16.mxu0 %v3066_v61  ;;  %2050 = vmatprep.subr.bf16.mxu1 %v3069_v62 }
 0x15d   :  { %1969 = vmatpush1.bf16.msra.mxu0 %v3064_v63  ;;  %2051 = vmatpush1.bf16.msra.mxu1 %v3067_v0 }
 0x15e   :  { %1970 = vmatprep.subr.bf16.mxu0 %v3072_v1  ;;  %2052 = vmatprep.subr.bf16.mxu1 %v3075_v2 }
 0x161   :  { %1971 = vmatpush1.bf16.msra.mxu0 %v3070_v3  ;;  %2053 = vmatpush1.bf16.msra.mxu1 %v3073_v5 }
 0x162   :  { %1972 = vmatprep.subr.bf16.mxu0 %v3078_v6  ;;  %2054 = vmatprep.subr.bf16.mxu1 %v3081_v7 }
 0x165   :  { %1973 = vmatpush1.bf16.msra.mxu0 %v3076_v8  ;;  %2055 = vmatpush1.bf16.msra.mxu1 %v3079_v9 }
 0x166   :  { %1974 = vmatprep.subr.bf16.mxu0 %v3084_v10  ;;  %2056 = vmatprep.subr.bf16.mxu1 %v3087_v11  ;;  %v3142_v11 = vld [vmem:[#allocation4 + $0x200] ss:$16 sps:$4 sm:$0xff]  }
 0x169   :  { %1975 = vmatpush1.bf16.msra.mxu0 %v3082_v12  ;;  %2057 = vmatpush1.bf16.msra.mxu1 %v3085_v13  ;;  %v3145_v12 = vld [vmem:[#allocation4 + $0x208] ss:$16 sps:$4 sm:$0xff]  }
 0x16a   :  { %1976 = vmatprep.subr.bf16.mxu0 %v3090_v14  ;;  %2058 = vmatprep.subr.bf16.mxu1 %v3093_v15  ;;  %v3150_v14 = vld [vmem:[#allocation4 + $0x224] ss:$16 sps:$4 sm:$0xff]   ;;  %v3153_v15 = vld [vmem:[#allocation4 + $0x22c] ss:$16 sps:$4 sm:$0xff]  }
 0x16d   :  { %1977 = vmatpush1.bf16.msra.mxu0 %v3088_v16  ;;  %2059 = vmatpush1.bf16.msra.mxu1 %v3091_v17  ;;  %v3148_v17 = vld [vmem:[#allocation4 + $0x220] ss:$16 sps:$4 sm:$0xff]  }
 0x16e   :  { %1978 = vmatprep.subr.bf16.mxu0 %v3096_v18  ;;  %2060 = vmatprep.subr.bf16.mxu1 %v3099_v23  ;;  %v3151_v18 = vld [vmem:[#allocation4 + $0x228] ss:$16 sps:$4 sm:$0xff]   ;;  %v3156_v23 = vld [vmem:[#allocation4 + $0x244] ss:$16 sps:$4 sm:$0xff]  }
 0x171   :  { %1979 = vmatpush1.bf16.msra.mxu0 %v3094_v24  ;;  %2061 = vmatpush1.bf16.msra.mxu1 %v3097_v25  ;;  %v3159_v24 = vld [vmem:[#allocation4 + $0x24c] ss:$16 sps:$4 sm:$0xff]   ;;  %v3154_v25 = vld [vmem:[#allocation4 + $0x240] ss:$16 sps:$4 sm:$0xff]  }
 0x172   :  { %1980 = vmatprep.subr.bf16.mxu0 %v3102_v26  ;;  %2062 = vmatprep.subr.bf16.mxu1 %v3105_v27  ;;  %v3157_v26 = vld [vmem:[#allocation4 + $0x248] ss:$16 sps:$4 sm:$0xff]   ;;  %v3162_v27 = vld [vmem:[#allocation4 + $0x264] ss:$16 sps:$4 sm:$0xff]  }
 0x175   :  { %1981 = vmatpush1.bf16.msra.mxu0 %v3100_v28  ;;  %2063 = vmatpush1.bf16.msra.mxu1 %v3103_v29  ;;  %v3165_v28 = vld [vmem:[#allocation4 + $0x26c] ss:$16 sps:$4 sm:$0xff]   ;;  %v3160_v29 = vld [vmem:[#allocation4 + $0x260] ss:$16 sps:$4 sm:$0xff]  }
 0x176   :  { %1982 = vmatprep.subr.bf16.mxu0 %v3108_v30  ;;  %2064 = vmatprep.subr.bf16.mxu1 %v3111_v32  ;;  %v3163_v30 = vld [vmem:[#allocation4 + $0x268] ss:$16 sps:$4 sm:$0xff]   ;;  %v3168_v32 = vld [vmem:[#allocation4 + $0x284] ss:$16 sps:$4 sm:$0xff]  }
 0x179   :  { %1983 = vmatpush1.bf16.msra.mxu0 %v3106_v33  ;;  %2065 = vmatpush1.bf16.msra.mxu1 %v3109_v34  ;;  %v3171_v33 = vld [vmem:[#allocation4 + $0x28c] ss:$16 sps:$4 sm:$0xff]   ;;  %v3166_v34 = vld [vmem:[#allocation4 + $0x280] ss:$16 sps:$4 sm:$0xff]  }
 0x17a   :  { %1984 = vmatprep.subr.bf16.mxu0 %v3114_v36  ;;  %2066 = vmatprep.subr.bf16.mxu1 %v3117_v37  ;;  %v3169_v36 = vld [vmem:[#allocation4 + $0x288] ss:$16 sps:$4 sm:$0xff]   ;;  %v3174_v37 = vld [vmem:[#allocation4 + $0x2a4] ss:$16 sps:$4 sm:$0xff]  }
 0x17d   :  { %1985 = vmatpush1.bf16.msra.mxu0 %v3112_v38  ;;  %2067 = vmatpush1.bf16.msra.mxu1 %v3115_v39  ;;  %v3177_v38 = vld [vmem:[#allocation4 + $0x2ac] ss:$16 sps:$4 sm:$0xff]   ;;  %v3172_v39 = vld [vmem:[#allocation4 + $0x2a0] ss:$16 sps:$4 sm:$0xff]  }
 0x17e   :  { %1986 = vmatprep.subr.bf16.mxu0 %v3120_v40  ;;  %2068 = vmatprep.subr.bf16.mxu1 %v3123_v41  ;;  %v3175_v40 = vld [vmem:[#allocation4 + $0x2a8] ss:$16 sps:$4 sm:$0xff]   ;;  %v3180_v41 = vld [vmem:[#allocation4 + $0x2c4] ss:$16 sps:$4 sm:$0xff]  }
 0x181   :  { %1987 = vmatpush1.bf16.msra.mxu0 %v3118_v42  ;;  %2069 = vmatpush1.bf16.msra.mxu1 %v3121_v43  ;;  %v3183_v42 = vld [vmem:[#allocation4 + $0x2cc] ss:$16 sps:$4 sm:$0xff]   ;;  %v3178_v43 = vld [vmem:[#allocation4 + $0x2c0] ss:$16 sps:$4 sm:$0xff]  }
 0x182   :  { %1988 = vmatprep.subr.bf16.mxu0 %v3126_v44  ;;  %2070 = vmatprep.subr.bf16.mxu1 %v3129_v4  ;;  %v3181_v44 = vld [vmem:[#allocation4 + $0x2c8] ss:$16 sps:$4 sm:$0xff]   ;;  %v3186_v4 = vld [vmem:[#allocation4 + $0x2e4] ss:$16 sps:$4 sm:$0xff]  }
 0x185   :  { %1989 = vmatpush1.bf16.msra.mxu0 %v3124_v45  ;;  %2071 = vmatpush1.bf16.msra.mxu1 %v3127_v46  ;;  %v3189_v45 = vld [vmem:[#allocation4 + $0x2ec] ss:$16 sps:$4 sm:$0xff]   ;;  %v3184_v46 = vld [vmem:[#allocation4 + $0x2e0] ss:$16 sps:$4 sm:$0xff]  }
 0x186   :  { %1990 = vmatprep.subr.bf16.mxu0 %v3132_v47  ;;  %2072 = vmatprep.subr.bf16.mxu1 %v3135_v48  ;;  %v3187_v47 = vld [vmem:[#allocation4 + $0x2e8] ss:$16 sps:$4 sm:$0xff]   ;;  %v3192_v48 = vld [vmem:[#allocation4 + $0x304] ss:$16 sps:$4 sm:$0xff]  }
 0x189   :  { %1991 = vmatpush1.bf16.msra.mxu0 %v3130_v49  ;;  %2073 = vmatpush1.bf16.msra.mxu1 %v3133_v20  ;;  %v3195_v49 = vld [vmem:[#allocation4 + $0x30c] ss:$16 sps:$4 sm:$0xff]   ;;  %v3190_v20 = vld [vmem:[#allocation4 + $0x300] ss:$16 sps:$4 sm:$0xff]  }
 0x18a   :  { %1992 = vmatprep.subr.bf16.mxu0 %v3138_v50  ;;  %2074 = vmatprep.subr.bf16.mxu1 %v3141_v51  ;;  %v3193_v50 = vld [vmem:[#allocation4 + $0x308] ss:$16 sps:$4 sm:$0xff]   ;;  %v3198_v51 = vld [vmem:[#allocation4 + $0x324] ss:$16 sps:$4 sm:$0xff]  }
 0x18d   :  { %1993 = vmatpush1.bf16.msra.mxu0 %v3136_v52  ;;  %2075 = vmatpush1.bf16.msra.mxu1 %v3139_v53  ;;  %v3201_v52 = vld [vmem:[#allocation4 + $0x32c] ss:$16 sps:$4 sm:$0xff]   ;;  %v3196_v53 = vld [vmem:[#allocation4 + $0x320] ss:$16 sps:$4 sm:$0xff]  }
 0x18e   :  { %2003 = vmatprep.subr.bf16.mxu0 %v3144_v31  ;;  %2085 = vmatprep.subr.bf16.mxu1 %v3147_v54  ;;  %v3199_v31 = vld [vmem:[#allocation4 + $0x328] ss:$16 sps:$4 sm:$0xff]   ;;  %v3204_v54 = vld [vmem:[#allocation4 + $0x344] ss:$16 sps:$4 sm:$0xff]  }
 0x223   :  { %v1075_v59 = vpop.f32.mrb[4].mxu0  ;;  %v3446_v60 = vpop.f32.mrb[4].mxu1 }
 0x224   :  { %v2823_v61 = vadd.f32 %v1075_v59, %v343_v56  ;;  %v1077_v62 = vpop.f32.mrb[5].mxu0  ;;  %v1159_v63 = vpop.f32.mrb[5].mxu1  ;;  %v3207_v56 = vld [vmem:[#allocation4 + $0x34c] ss:$16 sps:$4 sm:$0xff]   ;;  %v3210_v59 = vld [vmem:[#allocation4 + $0x364] ss:$16 sps:$4 sm:$0xff]  }
 0x225   :  { %v2824_v0 = vadd.f32 %v1077_v62, %v347_v57  ;;  %v2826_v1 = vadd.f32 %v1159_v63, %v355_v58  ;;  %v1079_v2 = vpop.f32.mrb[6].mxu0  ;;  %v1161_v3 = vpop.f32.mrb[6].mxu1  ;;  %v3202_v57 = vld [vmem:[#allocation4 + $0x340] ss:$16 sps:$4 sm:$0xff]   ;;  %v3205_v58 = vld [vmem:[#allocation4 + $0x348] ss:$16 sps:$4 sm:$0xff]  }
 0x226   :  { %v1164_v5 = vmax.f32 %v2823_v61, 0.0  ;;  %v1080_v6 = vpop.f32.mrb[7].mxu0  ;;  %v1162_v7 = vpop.f32.mrb[7].mxu1  ;;  %v3213_v61 = vld [vmem:[#allocation4 + $0x36c] ss:$16 sps:$4 sm:$0xff]  }
 0x227   :  { %v1165_v8 = vmax.f32 %v2824_v0, 0.0  ;;  %v1167_v9 = vmax.f32 %v2826_v1, 0.0  ;;  %v3208_v62 = vld [vmem:[#allocation4 + $0x360] ss:$16 sps:$4 sm:$0xff]   ;;  %v3211_v63 = vld [vmem:[#allocation4 + $0x368] ss:$16 sps:$4 sm:$0xff]  }
 0x228   :  { %v1168_v13 = vpack.c.bf16 %v1164_v5, %v1164_v5  ;;  %v3216_v0 = vld [vmem:[#allocation4 + $0x384] ss:$16 sps:$4 sm:$0xff]   ;;  %v3219_v1 = vld [vmem:[#allocation4 + $0x38c] ss:$16 sps:$4 sm:$0xff]   ;;  %v3214_v2 = vld [vmem:[#allocation4 + $0x380] ss:$16 sps:$4 sm:$0xff]  }
 0x229   :  { %v1169_v10 = vpack.c.bf16 %v1165_v8, %v1165_v8  ;;  %v1171_v16 = vpack.c.bf16 %v1167_v9, %v1167_v9  ;;  %v3217_v3 = vld [vmem:[#allocation4 + $0x388] ss:$16 sps:$4 sm:$0xff]   ;;  %v3222_v5 = vld [vmem:[#allocation4 + $0x3a4] ss:$16 sps:$4 sm:$0xff]   ;;  %v3225_v6 = vld [vmem:[#allocation4 + $0x3ac] ss:$16 sps:$4 sm:$0xff]   ;;  %v351_v9 = vrot.slane %v3438_v55, %v3430_v35 }
 0x22a   :  { %v3220_v7 = vld [vmem:[#allocation4 + $0x3a0] ss:$16 sps:$4 sm:$0xff]   ;;  %v3223_v8 = vld [vmem:[#allocation4 + $0x3a8] ss:$16 sps:$4 sm:$0xff]  }
 0x22b   :  { %1994 = vmatprep.mubr.bf16.mxu0 %v1169_v10  ;;  %2076 = vmatprep.mubr.bf16.mxu1 %v1169_v10  ;;  %v3228_v10 = vld [vmem:[#allocation4 + $0x3c4] ss:$16 sps:$4 sm:$0xff]  }
 0x22c   :  { %1995 = vmatmul.mubr.bf16.vlgmr.msra.gmra.mrb[8].mxu0 %v1168_v13  ;;  %2077 = vmatmul.mubr.bf16.vlgmr.msra.gmra.mrb[8].mxu1 %v1168_v13  ;;  %v3229_v13 = vld [vmem:[#allocation4 + $0x3c8] ss:$16 sps:$4 sm:$0xff]   ;;  %v3238_v55 = vld [vmem:[%s3567_s7 + $0x40] sm:$0xff]  }
 0x22d   :  { %2004 = vmatpush1.bf16.msra.mxu0 %v3142_v11  ;;  %2086 = vmatpush1.bf16.msra.mxu1 %v3145_v12  ;;  %v3231_v11 = vld [vmem:[#allocation4 + $0x3cc] ss:$16 sps:$4 sm:$0xff]   ;;  %v3226_v12 = vld [vmem:[#allocation4 + $0x3c0] ss:$16 sps:$4 sm:$0xff]  }
 0x22e   :  { %2035 = vmatprep.mubr.bf16.mxu0 %v1171_v16  ;;  %2117 = vmatprep.mubr.bf16.mxu1 %v1171_v16  ;;  %v3237_v16 = vld [vmem:[#allocation4 + $0x3ec] ss:$16 sps:$4 sm:$0xff]  }
 0x22f   :  { %2005 = vmatprep.subr.bf16.mxu0 %v3150_v14  ;;  %2087 = vmatprep.subr.bf16.mxu1 %v3153_v15  ;;  %v2825_v14 = vadd.f32 %v3446_v60, %v351_v9  ;;  %v3234_v15 = vld [vmem:[#allocation4 + $0x3e4] ss:$16 sps:$4 sm:$0xff]  }
 0x230   :  { %v3240_v60 = vld [vmem:[%s3567_s7] sm:$0xff]  }
 0x231   :  { %2006 = vmatpush1.bf16.msra.mxu0 %v3148_v17  ;;  %2088 = vmatpush1.bf16.msra.mxu1 %v3151_v18  ;;  %v3232_v17 = vld [vmem:[#allocation4 + $0x3e0] ss:$16 sps:$4 sm:$0xff]   ;;  %v3235_v18 = vld [vmem:[#allocation4 + $0x3e8] ss:$16 sps:$4 sm:$0xff]  }
 0x232   :  { %2007 = vmatprep.subr.bf16.mxu0 %v3156_v23  ;;  %2089 = vmatprep.subr.bf16.mxu1 %v3159_v24  ;;  %v1166_v23 = vmax.f32 %v2825_v14, 0.0  ;;  %v3239_v24 = vld [vmem:[%s3567_s7 + $0xc0] sm:$0xff]  }
 0x235   :  { %2008 = vmatpush1.bf16.msra.mxu0 %v3154_v25  ;;  %2090 = vmatpush1.bf16.msra.mxu1 %v3157_v26  ;;  %v3241_v25 = vld [vmem:[%s3567_s7 + $0x80] sm:$0xff]   ;;  %v1170_v26 = vpack.c.bf16 %v1166_v23, %v1166_v23 }
 0x236   :  { %2009 = vmatprep.subr.bf16.mxu0 %v3162_v27  ;;  %2091 = vmatprep.subr.bf16.mxu1 %v3165_v28  ;;  %v3242_v27 = vld [vmem:[%s3567_s7 + $0x48] sm:$0xff]  }
 0x237   :  { %v3243_v28 = vld [vmem:[%s3567_s7 + $0xc8] sm:$0xff]  }
 0x239   :  { %2010 = vmatpush1.bf16.msra.mxu0 %v3160_v29  ;;  %2092 = vmatpush1.bf16.msra.mxu1 %v3163_v30  ;;  %v3244_v29 = vld [vmem:[%s3567_s7 + $0x8] sm:$0xff]  }
 0x23a   :  { %2011 = vmatprep.subr.bf16.mxu0 %v3168_v32  ;;  %2093 = vmatprep.subr.bf16.mxu1 %v3171_v33  ;;  %v3245_v30 = vld [vmem:[%s3567_s7 + $0x88] sm:$0xff]   ;;  %v3246_v32 = vld [vmem:[%s3567_s7 + $0x50] sm:$0xff]  }
 0x23b   :  { %v3247_v33 = vld [vmem:[%s3567_s7 + $0xd0] sm:$0xff]  }
 0x23d   :  { %2012 = vmatpush1.bf16.msra.mxu0 %v3166_v34  ;;  %2094 = vmatpush1.bf16.msra.mxu1 %v3169_v36  ;;  %v3248_v34 = vld [vmem:[%s3567_s7 + $0x10] sm:$0xff]  }
 0x23e   :  { %2013 = vmatprep.subr.bf16.mxu0 %v3174_v37  ;;  %2095 = vmatprep.subr.bf16.mxu1 %v3177_v38  ;;  %v3249_v36 = vld [vmem:[%s3567_s7 + $0x90] sm:$0xff]   ;;  %v3250_v37 = vld [vmem:[%s3567_s7 + $0x58] sm:$0xff]  }
 0x23f   :  { %v3251_v38 = vld [vmem:[%s3567_s7 + $0xd8] sm:$0xff]  }
 0x241   :  { %2014 = vmatpush1.bf16.msra.mxu0 %v3172_v39  ;;  %2096 = vmatpush1.bf16.msra.mxu1 %v3175_v40  ;;  %v3252_v39 = vld [vmem:[%s3567_s7 + $0x18] sm:$0xff]  }
 0x242   :  { %2015 = vmatprep.subr.bf16.mxu0 %v3180_v41  ;;  %2097 = vmatprep.subr.bf16.mxu1 %v3183_v42  ;;  %v3253_v40 = vld [vmem:[%s3567_s7 + $0x98] sm:$0xff]   ;;  %v3254_v41 = vld [vmem:[%s3567_s7 + $0x60] sm:$0xff]  }
 0x243   :  { %v3255_v42 = vld [vmem:[%s3567_s7 + $0xe0] sm:$0xff]  }
 0x245   :  { %2016 = vmatpush1.bf16.msra.mxu0 %v3178_v43  ;;  %2098 = vmatpush1.bf16.msra.mxu1 %v3181_v44  ;;  %v3256_v43 = vld [vmem:[%s3567_s7 + $0x20] sm:$0xff]  }
 0x246   :  { %2017 = vmatprep.subr.bf16.mxu0 %v3186_v4  ;;  %2099 = vmatprep.subr.bf16.mxu1 %v3189_v45  ;;  %v3257_v44 = vld [vmem:[%s3567_s7 + $0xa0] sm:$0xff]   ;;  %v3258_v4 = vld [vmem:[%s3567_s7 + $0x68] sm:$0xff]  }
 0x247   :  { %v3259_v45 = vld [vmem:[%s3567_s7 + $0xe8] sm:$0xff]  }
 0x249   :  { %2018 = vmatpush1.bf16.msra.mxu0 %v3184_v46  ;;  %2100 = vmatpush1.bf16.msra.mxu1 %v3187_v47  ;;  %v3260_v46 = vld [vmem:[%s3567_s7 + $0x28] sm:$0xff]  }
 0x24a   :  { %2019 = vmatprep.subr.bf16.mxu0 %v3192_v48  ;;  %2101 = vmatprep.subr.bf16.mxu1 %v3195_v49  ;;  %v3261_v47 = vld [vmem:[%s3567_s7 + $0xa8] sm:$0xff]   ;;  %v3262_v48 = vld [vmem:[%s3567_s7 + $0x70] sm:$0xff]  }
 0x24b   :  { %v3263_v49 = vld [vmem:[%s3567_s7 + $0xf0] sm:$0xff]  }
 0x24d   :  { %2020 = vmatpush1.bf16.msra.mxu0 %v3190_v20  ;;  %2102 = vmatpush1.bf16.msra.mxu1 %v3193_v50  ;;  %v3264_v20 = vld [vmem:[%s3567_s7 + $0x30] sm:$0xff]  }
 0x24e   :  { %2021 = vmatprep.subr.bf16.mxu0 %v3198_v51  ;;  %2103 = vmatprep.subr.bf16.mxu1 %v3201_v52  ;;  %v3265_v50 = vld [vmem:[%s3567_s7 + $0xb0] sm:$0xff]   ;;  %v3266_v51 = vld [vmem:[%s3567_s7 + $0x78] sm:$0xff]  }
 0x24f   :  { %v3267_v52 = vld [vmem:[%s3567_s7 + $0xf8] sm:$0xff]  }
 0x251   :  { %2022 = vmatpush1.bf16.msra.mxu0 %v3196_v53  ;;  %2104 = vmatpush1.bf16.msra.mxu1 %v3199_v31  ;;  %v3268_v53 = vld [vmem:[%s3567_s7 + $0x38] sm:$0xff]  }
 0x252   :  { %2023 = vmatprep.subr.bf16.mxu0 %v3204_v54  ;;  %2105 = vmatprep.subr.bf16.mxu1 %v3207_v56  ;;  %v3269_v31 = vld [vmem:[%s3567_s7 + $0xb8] sm:$0xff]   ;;  %v1300_v54 = vld [vmem:[%s3566_s6] sm:$0xf] }
 0x253   :  { %v1305_v56 = vrot.slane %v1300_v54, %v3408_v19 }
 0x255   :  { %2024 = vmatpush1.bf16.msra.mxu0 %v3202_v57  ;;  %2106 = vmatpush1.bf16.msra.mxu1 %v3205_v58  ;;  %v1313_v57 = vrot.slane %v1300_v54, %v3430_v35  ;;  %v1309_v58 = vrot.slane %v1300_v54, %v3416_v21 }
 0x256   :  { %2025 = vmatprep.subr.bf16.mxu0 %v3210_v59  ;;  %2107 = vmatprep.subr.bf16.mxu1 %v3213_v61  ;;  %v1317_v59 = vrot.slane %v1300_v54, %v3419_v22 }
 0x259   :  { %2026 = vmatpush1.bf16.msra.mxu0 %v3208_v62  ;;  %2108 = vmatpush1.bf16.msra.mxu1 %v3211_v63 }
 0x25a   :  { %2027 = vmatprep.subr.bf16.mxu0 %v3216_v0  ;;  %2109 = vmatprep.subr.bf16.mxu1 %v3219_v1 }
 0x25d   :  { %2028 = vmatpush1.bf16.msra.mxu0 %v3214_v2  ;;  %2110 = vmatpush1.bf16.msra.mxu1 %v3217_v3 }
 0x25e   :  { %2029 = vmatprep.subr.bf16.mxu0 %v3222_v5  ;;  %2111 = vmatprep.subr.bf16.mxu1 %v3225_v6 }
 0x261   :  { %2030 = vmatpush1.bf16.msra.mxu0 %v3220_v7  ;;  %2112 = vmatpush1.bf16.msra.mxu1 %v3223_v8 }
 0x262   :  { %2031 = vmatprep.subr.bf16.mxu0 %v3228_v10  ;;  %2113 = vmatprep.subr.bf16.mxu1 %v3231_v11 }
 0x265   :  { %2032 = vmatpush1.bf16.msra.mxu0 %v3226_v12  ;;  %2114 = vmatpush1.bf16.msra.mxu1 %v3229_v13 }
 0x266   :  { %2033 = vmatprep.subr.bf16.mxu0 %v3234_v15  ;;  %2115 = vmatprep.subr.bf16.mxu1 %v3237_v16 }
 0x269   :  { %2034 = vmatpush1.bf16.msra.mxu0 %v3232_v17  ;;  %2116 = vmatpush1.bf16.msra.mxu1 %v3235_v18 }
 0x26a   :  { %2779 = vmatprep.subr.bf16.mxu0 %v3238_v55  ;;  %2801 = vmatprep.subr.bf16.mxu1 %v3239_v24 }
 0x26c   :  { %2036 = vmatmul.mubr.bf16.vlgmr.msra.gmra.mrb[8].mxu0 %v1170_v26  ;;  %2118 = vmatmul.mubr.bf16.vlgmr.msra.gmra.mrb[8].mxu1 %v1170_v26 }
 0x26d   :  { %2780 = vmatpush3.bf16.msra.mxu0 %v3240_v60  ;;  %2802 = vmatpush3.bf16.msra.mxu1 %v3241_v25  ;;  %v2778_v60 = vld [vmem:[%s3568_s8] ss:$0 sm:$0xff] }
 0x26e   :  { %2781 = vmatprep.subr.bf16.mxu0 %v3242_v27  ;;  %2803 = vmatprep.subr.bf16.mxu1 %v3243_v28 }
 0x271   :  { %2782 = vmatpush3.bf16.msra.mxu0 %v3244_v29  ;;  %2804 = vmatpush3.bf16.msra.mxu1 %v3245_v30 }
 0x272   :  { %2783 = vmatprep.subr.bf16.mxu0 %v3246_v32  ;;  %2805 = vmatprep.subr.bf16.mxu1 %v3247_v33 }
 0x275   :  { %2784 = vmatpush3.bf16.msra.mxu0 %v3248_v34  ;;  %2806 = vmatpush3.bf16.msra.mxu1 %v3249_v36 }
 0x276   :  { %2785 = vmatprep.subr.bf16.mxu0 %v3250_v37  ;;  %2807 = vmatprep.subr.bf16.mxu1 %v3251_v38 }
 0x279   :  { %2786 = vmatpush3.bf16.msra.mxu0 %v3252_v39  ;;  %2808 = vmatpush3.bf16.msra.mxu1 %v3253_v40 }
 0x27a   :  { %2787 = vmatprep.subr.bf16.mxu0 %v3254_v41  ;;  %2809 = vmatprep.subr.bf16.mxu1 %v3255_v42 }
 0x27d   :  { %2788 = vmatpush3.bf16.msra.mxu0 %v3256_v43  ;;  %2810 = vmatpush3.bf16.msra.mxu1 %v3257_v44 }
 0x27e   :  { %2789 = vmatprep.subr.bf16.mxu0 %v3258_v4  ;;  %2811 = vmatprep.subr.bf16.mxu1 %v3259_v45 }
 0x281   :  { %2790 = vmatpush3.bf16.msra.mxu0 %v3260_v46  ;;  %2812 = vmatpush3.bf16.msra.mxu1 %v3261_v47 }
 0x282   :  { %2791 = vmatprep.subr.bf16.mxu0 %v3262_v48  ;;  %2813 = vmatprep.subr.bf16.mxu1 %v3263_v49 }
 0x285   :  { %2792 = vmatpush3.bf16.msra.mxu0 %v3264_v20  ;;  %2814 = vmatpush3.bf16.msra.mxu1 %v3265_v50 }
 0x286   :  { %2793 = vmatprep.subr.bf16.mxu0 %v3266_v51  ;;  %2815 = vmatprep.subr.bf16.mxu1 %v3267_v52 }
 0x289   :  { %2794 = vmatpush3.bf16.msra.mxu0 %v3268_v53  ;;  %2816 = vmatpush3.bf16.msra.mxu1 %v3269_v31 }
 0x33f   :  { %v2037_v61 = vpop.f32.mrb[8].mxu0  ;;  %v2119_v62 = vpop.f32.mrb[8].mxu1 }
 0x340   :  { %v2827_v63 = vadd.f32 %v2037_v61, %v1305_v56  ;;  %v2829_v0 = vadd.f32 %v2119_v62, %v1313_v57  ;;  %v2039_v1 = vpop.f32.mrb[9].mxu0  ;;  %v2121_v2 = vpop.f32.mrb[9].mxu1 }
 0x341   :  { %v2828_v3 = vadd.f32 %v2039_v1, %v1309_v58  ;;  %v2830_v5 = vadd.f32 %v2121_v2, %v1317_v59  ;;  %v2041_v6 = vpop.f32.mrb[10].mxu0  ;;  %v2123_v7 = vpop.f32.mrb[10].mxu1 }
 0x342   :  { %v2126_v8 = vmax.f32 %v2827_v63, 0.0  ;;  %v2128_v9 = vmax.f32 %v2829_v0, 0.0  ;;  %v2042_v10 = vpop.f32.mrb[11].mxu0  ;;  %v2124_v19 = vpop.f32.mrb[11].mxu1 }
 0x343   :  { %v2127_v11 = vmax.f32 %v2828_v3, 0.0  ;;  %v2129_v35 = vmax.f32 %v2830_v5, 0.0 }
 0x344   :  { %v2130_v13 = vpack.c.bf16 %v2126_v8, %v2126_v8  ;;  %v2132_v22 = vpack.c.bf16 %v2128_v9, %v2128_v9 }
 0x345   :  { %v2131_v12 = vpack.c.bf16 %v2127_v11, %v2127_v11  ;;  %v2133_v21 = vpack.c.bf16 %v2129_v35, %v2129_v35 }
 0x347   :  { %2422 = vmatprep.mubr.bf16.mxu0 %v2131_v12  ;;  %2462 = vmatprep.mubr.bf16.mxu1 %v2133_v21 }
 0x348   :  { %2423 = vmatmul.mubr.bf16.vlgmr.msra.gmra.mrb[12].mxu0 %v2130_v13  ;;  %2463 = vmatmul.mubr.bf16.vlgmr.msra.gmra.mrb[12].mxu1 %v2132_v22 }
 0x41b   :  { %v2795_v14 = vpop.f32.mrb[12].mxu0  ;;  %v2817_v15 = vpop.f32.mrb[12].mxu1 }
 0x41c   :  { %v2796_v16 = vpop.f32.mrb[13].mxu0  ;;  %v2818_v17 = vpop.f32.mrb[13].mxu1 }
 0x41d   :  { %v2797_v18 = vadd.f32 %v2796_v16, %v2795_v14  ;;  %v2819_v23 = vadd.f32 %v2818_v17, %v2817_v15  ;;  %v2798_v55 = vpop.f32.mrb[14].mxu0  ;;  %v2820_v24 = vpop.f32.mrb[14].mxu1 }
 0x41e   :  { %v2799_v25 = vpop.f32.mrb[15].mxu0  ;;  %v2821_v26 = vpop.f32.mrb[15].mxu1 }
 0x41f   :  { %v2465_v27 = vadd.f32 %v2819_v23, %v2797_v18 }
 0x421   :  { %v2477_v28 = vadd.f32 %v2778_v60, %v2465_v27 }
 0x423   :  { %2479 = vst.msk [vmem:[%s3569_s9] sm:$0xff] %vm2478_vm2, %v2477_v28 }
 0x424   :  { %2484 = vsyncpa [#allocation3], 1 }
 0x425   :  { %2485 = vsyncpa [#allocation5], 1 }

</bundles_post_ra>
